<compile_context>
chip_gen: v6e
topology: v6e:2x2x1
jax: 0.10.0
libtpu: 0.0.40
codegen_flags: <defaults>
</compile_context>

<pallas_src>
import jax
import jax.numpy as jnp
from jax.experimental import pallas as pl
from jax.experimental.pallas import tpu as pltpu


def _round_up(x, m):
    return ((x + m - 1) // m) * m


def _pad_to(a, shape):
    pads = [(0, t - s) for s, t in zip(a.shape, shape)]
    return jnp.pad(a, pads)


def vae_kernel(
    x_ref, eps_ref,
    w_ih_ref, b_ih_ref,      # inpimg_to_hidden            (Dp, Hp) bf16 / (1, Hp) f32
    w_hms_ref, b_hms_ref,    # fused hidden_to_{mean,var}  (Hp, 2*Zp) / (1, 2*Zp)
    w_zh_ref, b_zh_ref,      # z_to_hidden                 (Zp, Hp) / (1, Hp)
    w_ho_ref, b_ho_ref,      # hidden_to_out               (Hp, Dp) / (1, Dp)
    ms_ref, recon_ref,
):
    zp = ms_ref.shape[-1] // 2            # static padded z dim

    x = x_ref[...]                        # (TB, Dp) bf16

    # ---- encoder ----
    h = jnp.dot(x, w_ih_ref[...], preferred_element_type=jnp.float32) + b_ih_ref[...]
    h = jnp.maximum(h, 0.0)               # ReLU in f32 (VPU)

    ms = jnp.dot(h.astype(jnp.bfloat16), w_hms_ref[...],
                 preferred_element_type=jnp.float32) + b_hms_ref[...]
    mean = ms[:, :zp]
    sigma = ms[:, zp:]

    # ---- reparameterization:  z = mean + sigma * eps,  eps ~ U[0,1) ----
    z = mean + sigma * eps_ref[...]

    # ---- decoder ----
    hz = jnp.dot(z.astype(jnp.bfloat16), w_zh_ref[...],
                 preferred_element_type=jnp.float32) + b_zh_ref[...]
    hz = jnp.maximum(hz, 0.0)             # ReLU

    logits = jnp.dot(hz.astype(jnp.bfloat16), w_ho_ref[...],
                     preferred_element_type=jnp.float32) + b_ho_ref[...]
    recon = jax.nn.sigmoid(logits)        # EUP exp + reciprocal

    ms_ref[...] = ms                      # lane-dense (TB, 2*Zp) slab
    recon_ref[...] = recon                # lane-dense (TB, Dp)


def vae_forward(x, eps, params):
    """params: dict of (W, b) per layer with W transposed to (in, out), f32."""
    B, D = x.shape
    H = params["w_ih"].shape[1]
    Z = params["w_hm"].shape[1]

    Dp = _round_up(D, 128)
    Hp = _round_up(H, 128)
    Zp = _round_up(Z, 128)

    TB = 256 if B >= 256 else _round_up(B, 8)   # batch tile (multiple of 8 sublanes)
    Bp = _round_up(B, TB)

    # Pad batch/feature dims with zeros and cast matmul operands to bf16.
    x_p = _pad_to(x, (Bp, Dp)).astype(jnp.bfloat16)
    eps_p = _pad_to(eps, (Bp, Zp)).astype(jnp.float32)

    w_ih = _pad_to(params["w_ih"], (Dp, Hp)).astype(jnp.bfloat16)
    b_ih = _pad_to(params["b_ih"], (1, Hp)).astype(jnp.float32)
    w_hms = jnp.concatenate(
        [_pad_to(params["w_hm"], (Hp, Zp)), _pad_to(params["w_hv"], (Hp, Zp))],
        axis=1).astype(jnp.bfloat16)
    b_hms = jnp.concatenate(
        [_pad_to(params["b_hm"], (1, Zp)), _pad_to(params["b_hv"], (1, Zp))],
        axis=1).astype(jnp.float32)
    w_zh = _pad_to(params["w_zh"], (Zp, Hp)).astype(jnp.bfloat16)
    b_zh = _pad_to(params["b_zh"], (1, Hp)).astype(jnp.float32)
    w_ho = _pad_to(params["w_ho"], (Hp, Dp)).astype(jnp.bfloat16)
    b_ho = _pad_to(params["b_ho"], (1, Dp)).astype(jnp.float32)

    def resident(shape):
        # Weight/bias stays in VMEM across all batch tiles.
        return pl.BlockSpec(shape, lambda i: (0, 0))

    in_specs = [
        pl.BlockSpec((TB, Dp), lambda i: (i, 0)),      # x tile
        pl.BlockSpec((TB, Zp), lambda i: (i, 0)),      # eps tile
        resident((Dp, Hp)), resident((1, Hp)),
        resident((Hp, 2 * Zp)), resident((1, 2 * Zp)),
        resident((Zp, Hp)), resident((1, Hp)),
        resident((Hp, Dp)), resident((1, Dp)),
    ]
    out_specs = (
        pl.BlockSpec((TB, 2 * Zp), lambda i: (i, 0)),  # mean|sigma slab
        pl.BlockSpec((TB, Dp), lambda i: (i, 0)),      # reconstruction
    )

    flops = 2 * Bp * (Dp * Hp + Hp * 2 * Zp + Zp * Hp + Hp * Dp)
    bytes_accessed = (
        x_p.size * 2 + eps_p.size * 4
        + (w_ih.size + w_hms.size + w_zh.size + w_ho.size) * 2
        + (b_ih.size + b_hms.size + b_zh.size + b_ho.size) * 4
        + Bp * 2 * Zp * 4 + Bp * Dp * 4
    )

    ms_p, recon_p = pl.pallas_call(
        vae_kernel,
        grid=(Bp // TB,),
        out_shape=(
            jax.ShapeDtypeStruct((Bp, 2 * Zp), jnp.float32),   # mean | sigma (padded)
            jax.ShapeDtypeStruct((Bp, Dp), jnp.float32),       # reconstruction (padded)
        ),
        in_specs=in_specs,
        out_specs=out_specs,
        compiler_params=pltpu.CompilerParams(
            dimension_semantics=("parallel",)),                # v7x dual-TC sharding
        cost_estimate=pl.CostEstimate(
            flops=flops, transcendentals=Bp * Dp, bytes_accessed=bytes_accessed),
    )(x_p, eps_p, w_ih, b_ih, w_hms, b_hms, w_zh, b_zh, w_ho, b_ho)

    mean = ms_p[:B, :Z]
    sigma = ms_p[:B, Zp:Zp + Z]
    recon = recon_p[:B, :D]
    return mean, sigma, recon


def init_params(key, input_dim, hidden_dim, z_dim):
    """Deterministic init mimicking nn.Linear (uniform in +-1/sqrt(fan_in)).
    Weights are stored transposed: shape (in_features, out_features)."""
    def linear(key, fan_in, fan_out):
        kw, kb = jax.random.split(key)
        bound = 1.0 / jnp.sqrt(fan_in)
        w = jax.random.uniform(kw, (fan_in, fan_out), jnp.float32, -bound, bound)
        b = jax.random.uniform(kb, (1, fan_out), jnp.float32, -bound, bound)
        return w, b

    k1, k2, k3, k4, k5 = jax.random.split(key, 5)
    w_ih, b_ih = linear(k1, input_dim, hidden_dim)
    w_hm, b_hm = linear(k2, hidden_dim, z_dim)
    w_hv, b_hv = linear(k3, hidden_dim, z_dim)
    w_zh, b_zh = linear(k4, z_dim, hidden_dim)
    w_ho, b_ho = linear(k5, hidden_dim, input_dim)
    return dict(
        w_ih=w_ih, b_ih=b_ih,
        w_hm=w_hm, b_hm=b_hm,
        w_hv=w_hv, b_hv=b_hv,
        w_zh=w_zh, b_zh=b_zh,
        w_ho=w_ho, b_ho=b_ho,
    )


def vae_reference_bf16(x, eps, p):
    """Pure-JAX reference with the same bf16-operand / f32-accumulate matmuls."""
    bf = jnp.bfloat16

    def mm(a, w):
        return jnp.dot(a.astype(bf), w.astype(bf), preferred_element_type=jnp.float32)

    h = jnp.maximum(mm(x, p["w_ih"]) + p["b_ih"], 0.0)
    mean = mm(h, p["w_hm"]) + p["b_hm"]
    sigma = mm(h, p["w_hv"]) + p["b_hv"]
    z = mean + sigma * eps
    hz = jnp.maximum(mm(z, p["w_zh"]) + p["b_zh"], 0.0)
    recon = jax.nn.sigmoid(mm(hz, p["w_ho"]) + p["b_ho"])
    return mean, sigma, recon


def vae_reference_f32(x, eps, p):
    """Full-precision reference replicating the PyTorch forward."""
    h = jax.nn.relu(x @ p["w_ih"] + p["b_ih"])
    mean = h @ p["w_hm"] + p["b_hm"]
    sigma = h @ p["w_hv"] + p["b_hv"]
    z = mean + sigma * eps
    hz = jax.nn.relu(z @ p["w_zh"] + p["b_zh"])
    recon = jax.nn.sigmoid(hz @ p["w_ho"] + p["b_ho"])
    return mean, sigma, recon


if __name__ == "__main__":
    key = jax.random.PRNGKey(0)
    k_param, k_x, k_eps = jax.random.split(key, 3)

    batch = 8
    input_dim = 64
    hidden_dim = 32
    z_dim = 16

    params = init_params(k_param, input_dim, hidden_dim, z_dim)
    x = jax.random.uniform(k_x, (batch, input_dim), jnp.float32)      # "image" in [0,1)
    eps = jax.random.uniform(k_eps, (batch, z_dim), jnp.float32)      # torch.rand_like -> U[0,1)

    mean, sigma, recon = jax.block_until_ready(vae_forward(x, eps, params))

    # tight check vs a reference using the same bf16-operand matmuls
    mean_r, sigma_r, recon_r = vae_reference_bf16(x, eps, params)
    assert jnp.allclose(mean, mean_r, atol=1e-3, rtol=1e-3)
    assert jnp.allclose(sigma, sigma_r, atol=1e-3, rtol=1e-3)
    assert jnp.allclose(recon, recon_r, atol=1e-3, rtol=1e-3)

    # loose sanity check vs the full-f32 PyTorch-equivalent forward
    mean_f, sigma_f, recon_f = vae_reference_f32(x, eps, params)
    assert jnp.allclose(mean, mean_f, atol=0.1, rtol=0.1)
    assert jnp.allclose(sigma, sigma_f, atol=0.1, rtol=0.1)
    assert jnp.allclose(recon, recon_f, atol=0.1, rtol=0.1)

    print("KERNEL_OK")
</pallas_src>

<mosaic_0001>
module attributes {stable_mosaic.version = 11 : i64} {
  func.func @vae_kernel(%arg0: i32, %arg1: memref<8x128xbf16, #tpu.memory_space<vmem>>, %arg2: memref<8x128xf32, #tpu.memory_space<vmem>>, %arg3: memref<128x128xbf16, #tpu.memory_space<vmem>>, %arg4: memref<1x128xf32, #tpu.memory_space<vmem>>, %arg5: memref<128x256xbf16, #tpu.memory_space<vmem>>, %arg6: memref<1x256xf32, #tpu.memory_space<vmem>>, %arg7: memref<128x128xbf16, #tpu.memory_space<vmem>>, %arg8: memref<1x128xf32, #tpu.memory_space<vmem>>, %arg9: memref<128x128xbf16, #tpu.memory_space<vmem>>, %arg10: memref<1x128xf32, #tpu.memory_space<vmem>>, %arg11: memref<8x256xf32, #tpu.memory_space<vmem>>, %arg12: memref<8x128xf32, #tpu.memory_space<vmem>>) attributes {dimension_semantics = [#tpu.dimension_semantics<parallel>], iteration_bounds = array<i64: 1>, scalar_prefetch = 0 : i64, scratch_operands = 0 : i64, tpu.core_type = #tpu.core_type<tc>, window_params = [{transform_indices = @transform_0, window_bounds = array<i64: 8, 128>}, {transform_indices = @transform_1, window_bounds = array<i64: 8, 128>}, {pipeline_mode = #tpu.pipeline_mode<synchronous>, transform_indices = @transform_2, window_bounds = array<i64: 128, 128>}, {pipeline_mode = #tpu.pipeline_mode<synchronous>, transform_indices = @transform_3, window_bounds = array<i64: 1, 128>}, {pipeline_mode = #tpu.pipeline_mode<synchronous>, transform_indices = @transform_4, window_bounds = array<i64: 128, 256>}, {pipeline_mode = #tpu.pipeline_mode<synchronous>, transform_indices = @transform_5, window_bounds = array<i64: 1, 256>}, {pipeline_mode = #tpu.pipeline_mode<synchronous>, transform_indices = @transform_6, window_bounds = array<i64: 128, 128>}, {pipeline_mode = #tpu.pipeline_mode<synchronous>, transform_indices = @transform_7, window_bounds = array<i64: 1, 128>}, {pipeline_mode = #tpu.pipeline_mode<synchronous>, transform_indices = @transform_8, window_bounds = array<i64: 128, 128>}, {pipeline_mode = #tpu.pipeline_mode<synchronous>, transform_indices = @transform_9, window_bounds = array<i64: 1, 128>}, {transform_indices = @transform_10, window_bounds = array<i64: 8, 256>}, {transform_indices = @transform_11, window_bounds = array<i64: 8, 128>}]} {
    %c0 = arith.constant 0 : index
    %c0_0 = arith.constant 0 : index
    %0 = vector.load %arg1[%c0, %c0_0] : memref<8x128xbf16, #tpu.memory_space<vmem>>, vector<8x128xbf16>
    %c0_1 = arith.constant 0 : index
    %c0_2 = arith.constant 0 : index
    %1 = vector.load %arg3[%c0_1, %c0_2] : memref<128x128xbf16, #tpu.memory_space<vmem>>, vector<128x128xbf16>
    %cst = arith.constant dense<0.000000e+00> : vector<8x128xf32>
    %2 = tpu.matmul %0, %1, %cst {dimension_numbers = #tpu.dot_dimension_numbers<[1], [0], [0], [1], [0, 0, 1, 1], [], []>} : vector<8x128xbf16>, vector<128x128xbf16>, vector<8x128xf32> -> vector<8x128xf32>
    %c0_3 = arith.constant 0 : index
    %c0_4 = arith.constant 0 : index
    %3 = vector.load %arg4[%c0_3, %c0_4] : memref<1x128xf32, #tpu.memory_space<vmem>>, vector<1x128xf32>
    %4 = vector.broadcast %3 : vector<1x128xf32> to vector<8x128xf32>
    %5 = arith.addf %2, %4 : vector<8x128xf32>
    %cst_5 = arith.constant 0.000000e+00 : f32
    %6 = vector.broadcast %cst_5 : f32 to vector<8x128xf32>
    %7 = arith.maximumf %5, %6 : vector<8x128xf32>
    %8 = arith.truncf %7 : vector<8x128xf32> to vector<8x128xbf16>
    %c0_6 = arith.constant 0 : index
    %c0_7 = arith.constant 0 : index
    %9 = vector.load %arg5[%c0_6, %c0_7] : memref<128x256xbf16, #tpu.memory_space<vmem>>, vector<128x256xbf16>
    %cst_8 = arith.constant dense<0.000000e+00> : vector<8x256xf32>
    %10 = tpu.matmul %8, %9, %cst_8 {dimension_numbers = #tpu.dot_dimension_numbers<[1], [0], [0], [1], [0, 0, 1, 1], [], []>} : vector<8x128xbf16>, vector<128x256xbf16>, vector<8x256xf32> -> vector<8x256xf32>
    %c0_9 = arith.constant 0 : index
    %c0_10 = arith.constant 0 : index
    %11 = vector.load %arg6[%c0_9, %c0_10] : memref<1x256xf32, #tpu.memory_space<vmem>>, vector<1x256xf32>
    %12 = vector.broadcast %11 : vector<1x256xf32> to vector<8x256xf32>
    %13 = arith.addf %10, %12 : vector<8x256xf32>
    %14 = vector.extract_strided_slice %13 {offsets = [0, 0], sizes = [8, 128], strides = [1, 1]} : vector<8x256xf32> to vector<8x128xf32>
    %15 = vector.extract_strided_slice %13 {offsets = [0, 128], sizes = [8, 128], strides = [1, 1]} : vector<8x256xf32> to vector<8x128xf32>
    %c0_11 = arith.constant 0 : index
    %c0_12 = arith.constant 0 : index
    %16 = vector.load %arg2[%c0_11, %c0_12] : memref<8x128xf32, #tpu.memory_space<vmem>>, vector<8x128xf32>
    %17 = arith.mulf %15, %16 : vector<8x128xf32>
    %18 = arith.addf %14, %17 : vector<8x128xf32>
    %19 = arith.truncf %18 : vector<8x128xf32> to vector<8x128xbf16>
    %c0_13 = arith.constant 0 : index
    %c0_14 = arith.constant 0 : index
    %20 = vector.load %arg7[%c0_13, %c0_14] : memref<128x128xbf16, #tpu.memory_space<vmem>>, vector<128x128xbf16>
    %cst_15 = arith.constant dense<0.000000e+00> : vector<8x128xf32>
    %21 = tpu.matmul %19, %20, %cst_15 {dimension_numbers = #tpu.dot_dimension_numbers<[1], [0], [0], [1], [0, 0, 1, 1], [], []>} : vector<8x128xbf16>, vector<128x128xbf16>, vector<8x128xf32> -> vector<8x128xf32>
    %c0_16 = arith.constant 0 : index
    %c0_17 = arith.constant 0 : index
    %22 = vector.load %arg8[%c0_16, %c0_17] : memref<1x128xf32, #tpu.memory_space<vmem>>, vector<1x128xf32>
    %23 = vector.broadcast %22 : vector<1x128xf32> to vector<8x128xf32>
    %24 = arith.addf %21, %23 : vector<8x128xf32>
    %cst_18 = arith.constant 0.000000e+00 : f32
    %25 = vector.broadcast %cst_18 : f32 to vector<8x128xf32>
    %26 = arith.maximumf %24, %25 : vector<8x128xf32>
    %27 = arith.truncf %26 : vector<8x128xf32> to vector<8x128xbf16>
    %c0_19 = arith.constant 0 : index
    %c0_20 = arith.constant 0 : index
    %28 = vector.load %arg9[%c0_19, %c0_20] : memref<128x128xbf16, #tpu.memory_space<vmem>>, vector<128x128xbf16>
    %cst_21 = arith.constant dense<0.000000e+00> : vector<8x128xf32>
    %29 = tpu.matmul %27, %28, %cst_21 {dimension_numbers = #tpu.dot_dimension_numbers<[1], [0], [0], [1], [0, 0, 1, 1], [], []>} : vector<8x128xbf16>, vector<128x128xbf16>, vector<8x128xf32> -> vector<8x128xf32>
    %c0_22 = arith.constant 0 : index
    %c0_23 = arith.constant 0 : index
    %30 = vector.load %arg10[%c0_22, %c0_23] : memref<1x128xf32, #tpu.memory_space<vmem>>, vector<1x128xf32>
    %31 = vector.broadcast %30 : vector<1x128xf32> to vector<8x128xf32>
    %32 = arith.addf %29, %31 : vector<8x128xf32>
    %33 = arith.negf %32 : vector<8x128xf32>
    %34 = math.exp %33 : vector<8x128xf32>
    %cst_24 = arith.constant 1.000000e+00 : f32
    %35 = vector.broadcast %cst_24 : f32 to vector<8x128xf32>
    %36 = arith.addf %35, %34 : vector<8x128xf32>
    %37 = arith.divf %35, %36 : vector<8x128xf32>
    %c0_25 = arith.constant 0 : index
    %c0_26 = arith.constant 0 : index
    %38 = vector.load %arg11[%c0_25, %c0_26] : memref<8x256xf32, #tpu.memory_space<vmem>>, vector<8x256xf32>
    tpu.vector_store %arg11[%c0_25, %c0_26], %13 {strides = array<i32>} : memref<8x256xf32, #tpu.memory_space<vmem>>, vector<8x256xf32>,
    %c0_27 = arith.constant 0 : index
    %c0_28 = arith.constant 0 : index
    %39 = vector.load %arg12[%c0_27, %c0_28] : memref<8x128xf32, #tpu.memory_space<vmem>>, vector<8x128xf32>
    tpu.vector_store %arg12[%c0_27, %c0_28], %37 {strides = array<i32>} : memref<8x128xf32, #tpu.memory_space<vmem>>, vector<8x128xf32>,
    return
  }
  func.func @transform_0(%arg0: i32) -> (i32, i32) {
    %c0_i32 = arith.constant 0 : i32
    %c0_i32_0 = arith.constant 0 : i32
    return %arg0, %c0_i32 : i32, i32
  }
  func.func @transform_1(%arg0: i32) -> (i32, i32) {
    %c0_i32 = arith.constant 0 : i32
    %c0_i32_0 = arith.constant 0 : i32
    return %arg0, %c0_i32 : i32, i32
  }
  func.func @transform_2(%arg0: i32) -> (i32, i32) {
    %c0_i32 = arith.constant 0 : i32
    %c0_i32_0 = arith.constant 0 : i32
    %c0_i32_1 = arith.constant 0 : i32
    return %c0_i32, %c0_i32_0 : i32, i32
  }
  func.func @transform_3(%arg0: i32) -> (i32, i32) {
    %c0_i32 = arith.constant 0 : i32
    %c0_i32_0 = arith.constant 0 : i32
    %c0_i32_1 = arith.constant 0 : i32
    return %c0_i32, %c0_i32_0 : i32, i32
  }
  func.func @transform_4(%arg0: i32) -> (i32, i32) {
    %c0_i32 = arith.constant 0 : i32
    %c0_i32_0 = arith.constant 0 : i32
    %c0_i32_1 = arith.constant 0 : i32
    return %c0_i32, %c0_i32_0 : i32, i32
  }
  func.func @transform_5(%arg0: i32) -> (i32, i32) {
    %c0_i32 = arith.constant 0 : i32
    %c0_i32_0 = arith.constant 0 : i32
    %c0_i32_1 = arith.constant 0 : i32
    return %c0_i32, %c0_i32_0 : i32, i32
  }
  func.func @transform_6(%arg0: i32) -> (i32, i32) {
    %c0_i32 = arith.constant 0 : i32
    %c0_i32_0 = arith.constant 0 : i32
    %c0_i32_1 = arith.constant 0 : i32
    return %c0_i32, %c0_i32_0 : i32, i32
  }
  func.func @transform_7(%arg0: i32) -> (i32, i32) {
    %c0_i32 = arith.constant 0 : i32
    %c0_i32_0 = arith.constant 0 : i32
    %c0_i32_1 = arith.constant 0 : i32
    return %c0_i32, %c0_i32_0 : i32, i32
  }
  func.func @transform_8(%arg0: i32) -> (i32, i32) {
    %c0_i32 = arith.constant 0 : i32
    %c0_i32_0 = arith.constant 0 : i32
    %c0_i32_1 = arith.constant 0 : i32
    return %c0_i32, %c0_i32_0 : i32, i32
  }
  func.func @transform_9(%arg0: i32) -> (i32, i32) {
    %c0_i32 = arith.constant 0 : i32
    %c0_i32_0 = arith.constant 0 : i32
    %c0_i32_1 = arith.constant 0 : i32
    return %c0_i32, %c0_i32_0 : i32, i32
  }
  func.func @transform_10(%arg0: i32) -> (i32, i32) {
    %c0_i32 = arith.constant 0 : i32
    %c0_i32_0 = arith.constant 0 : i32
    return %arg0, %c0_i32 : i32, i32
  }
  func.func @transform_11(%arg0: i32) -> (i32, i32) {
    %c0_i32 = arith.constant 0 : i32
    %c0_i32_0 = arith.constant 0 : i32
    return %arg0, %c0_i32 : i32, i32
  }
}

</mosaic_0001>

<bundles_post_ra>
// kernel: tpu_custom_call.1
= control target key start
LH: loop header
LB: loop body
LE: loop exit
PB: predicated region body
PF: predicated region fallthrough
CT: control target
= control target key end

     0   :  { %17 = vsyncpa [#allocation3], 0  ;;  %s1161_s0 = inlined_call_operand.hbm [shape: bf16[8,128], index: 0, kind: input, shape index: {}]   ;;  %s1162_s1 = inlined_call_operand.hbm [shape: f32[8,128], index: 1, kind: input, shape index: {}]   ;;  %s1163_s2 = inlined_call_operand.hbm [shape: bf16[128,128], index: 2, kind: input, shape index: {}]   ;;  %s1164_s3 = inlined_call_operand.vmem [shape: f32[1,128], index: 3, kind: input, shape index: {}]   ;;  %s1165_s4 = inlined_call_operand.hbm [shape: bf16[128,256], index: 4, kind: input, shape index: {}]   ;;  %s1166_s5 = inlined_call_operand.vmem [shape: f32[1,256], index: 5, kind: input, shape index: {}]   ;;  %s1167_s6 = inlined_call_operand.hbm [shape: bf16[128,128], index: 6, kind: input, shape index: {}]   ;;  %s1168_s7 = inlined_call_operand.vmem [shape: f32[1,128], index: 7, kind: input, shape index: {}]   ;;  %s1169_s8 = inlined_call_operand.hbm [shape: bf16[128,128], index: 8, kind: input, shape index: {}]   ;;  %s1170_s9 = inlined_call_operand.vmem [shape: f32[1,128], index: 9, kind: input, shape index: {}]   ;;  %s1171_s10 = inlined_call_operand.hbm [shape: f32[8,256], index: 10, kind: output, shape index: {0}]   ;;  %s1172_s11 = inlined_call_operand.hbm [shape: f32[8,128], index: 11, kind: output, shape index: {1}]  }
   0x1   :  { %18 = vsyncpa [#allocation6], 0 }
   0x2   :  { %19 = vsyncpa [#allocation9], 0 }
   0x3   :  { %20 = vsyncpa [#allocation12], 0 }
   0x4   :  { %21 = vsyncpa [#allocation4], 0 }
   0x5   :  { %22 = vsyncpa [#allocation15], 0  ;;  %s1020_s17 = smov [#allocation5]   ;;  %s1021_s19 = smov [#allocation8]  }
   0x6   :  { %s39_s18 = sshll.u32 %s1020_s17, 4  ;;  %s62_s20 = sshll.u32 %s1021_s19, 4  ;;  %s40_s18 = int_to_ptr.vmem [resolvable:$true] %s39_s18  ;;  %s63_s20 = int_to_ptr.vmem [resolvable:$true] %s62_s20 }
   0x7   :  { %s856_s21 = scalar_lea.vmem %s40_s18, 128  ;;  %p861_p1 = scmp.lt.s32.totalorder %s40_s18, %s40_s18 }
   0x8   :  { %p857_p0 = scmp.ne.s32.totalorder %s40_s18, %s856_s21  ;;  %p862_p2 = scmp.lt.s32.totalorder %s856_s21, %s856_s21 }
   0xa   :  { %p863_p3 = por %p862_p2, %p861_p1 }
   0xc   :  { %p864_p4 = pnand %p863_p3, %p857_p0 }
   0xe   :  { %867 = shalt.err (!%p864_p4)
}
   0xf   :  { %42 = dma.hbm_to_vmem [thread:$0]  %s1162_s1, 128, %s40_s18, [#allocation6]  }
  0x10   :  { %s876_s24 = scalar_lea.vmem %s63_s20, 2048  ;;  %p881_p6 = scmp.lt.s32.totalorder %s63_s20, %s63_s20 }
  0x11   :  { %p877_p5 = scmp.ne.s32.totalorder %s63_s20, %s876_s24  ;;  %p882_p7 = scmp.lt.s32.totalorder %s876_s24, %s876_s24 }
  0x13   :  { %p883_p8 = por %p882_p7, %p881_p6 }
  0x15   :  { %p884_p9 = pnand %p883_p8, %p877_p5 }
  0x17   :  { %887 = shalt.err (!%p884_p9)
}
  0x18   :  { %s1022_s25 = smov 128   ;;  %s1023_s26 = smov 8  }
  0x19   :  { %68 = dma.hbm_to_vmem [thread:$0]  %s1165_s4, 2048, %s63_s20, [#allocation9], %s1022_s25, %s1022_s25, %s1023_s26  }
  0x1a   :  { %s1024_s29 = smov [#allocation2]   ;;  %s1025_s12 = smov [#allocation7]  }
  0x1b   :  { %s29_s30 = sshll.u32 %s1024_s29, 4  ;;  %s48_s13 = sshll.u32 %s1025_s12, 4  ;;  %s30_s30 = int_to_ptr.vmem [resolvable:$true] %s29_s30  ;;  %s49_s13 = int_to_ptr.vmem [resolvable:$true] %s48_s13 }
  0x1c   :  { %s896_s1 = scalar_lea.vmem %s30_s30, 64  ;;  %p901_p11 = scmp.lt.s32.totalorder %s30_s30, %s30_s30 }
  0x1d   :  { %p897_p10 = scmp.ne.s32.totalorder %s30_s30, %s896_s1  ;;  %p902_p12 = scmp.lt.s32.totalorder %s896_s1, %s896_s1 }
  0x1f   :  { %p903_p13 = por %p902_p12, %p901_p11 }
  0x21   :  { %p904_p0 = pnand %p903_p13, %p897_p10 }
  0x23   :  { %907 = shalt.err (!%p904_p0)
}
  0x24   :  { %32 = dma.hbm_to_vmem [thread:$0]  %s1161_s0, 64, %s30_s30, [#allocation3]  }
  0x25   :  { %s916_s16 = scalar_lea.vmem %s49_s13, 1024  ;;  %p921_p2 = scmp.lt.s32.totalorder %s49_s13, %s49_s13 }
  0x26   :  { %p917_p1 = scmp.ne.s32.totalorder %s49_s13, %s916_s16  ;;  %p922_p3 = scmp.lt.s32.totalorder %s916_s16, %s916_s16 }
  0x28   :  { %p923_p4 = por %p922_p3, %p921_p2 }
  0x2a   :  { %p924_p5 = pnand %p923_p4, %p917_p1 }
  0x2c   :  { %927 = shalt.err (!%p924_p5)
}
  0x2d   :  { %s1026_s4 = smov 64   ;;  %s1027_s17 = smov 4  }
  0x2e   :  { %54 = dma.hbm_to_vmem [thread:$0]  %s1163_s2, 1024, %s49_s13, [#allocation6], %s1026_s4, %s1026_s4, %s1027_s17  }
  0x2f   :  { %s1028_s20 = smov [#allocation10]   ;;  %s1029_s22 = smov [#allocation11]  }
  0x30   :  { %s76_s21 = sshll.u32 %s1028_s20, 4  ;;  %s90_s23 = sshll.u32 %s1029_s22, 4  ;;  %s77_s21 = int_to_ptr.vmem [resolvable:$true] %s76_s21  ;;  %s91_s23 = int_to_ptr.vmem [resolvable:$true] %s90_s23 }
  0x31   :  { %s936_s0 = scalar_lea.vmem %s77_s21, 1024  ;;  %p941_p7 = scmp.lt.s32.totalorder %s77_s21, %s77_s21 }
  0x32   :  { %p937_p6 = scmp.ne.s32.totalorder %s77_s21, %s936_s0  ;;  %p942_p8 = scmp.lt.s32.totalorder %s936_s0, %s936_s0 }
  0x34   :  { %p943_p9 = por %p942_p8, %p941_p7 }
  0x36   :  { %p944_p10 = pnand %p943_p9, %p937_p6 }
  0x38   :  { %947 = shalt.err (!%p944_p10)
}
  0x39   :  { %82 = dma.hbm_to_vmem [thread:$0]  %s1167_s6, 1024, %s77_s21, [#allocation9], %s1026_s4, %s1026_s4, %s1027_s17  }
  0x3a   :  { %s956_s26 = scalar_lea.vmem %s91_s23, 1024  ;;  %p961_p12 = scmp.lt.s32.totalorder %s91_s23, %s91_s23 }
  0x3b   :  { %p957_p11 = scmp.ne.s32.totalorder %s91_s23, %s956_s26  ;;  %p962_p13 = scmp.lt.s32.totalorder %s956_s26, %s956_s26 }
  0x3d   :  { %p963_p0 = por %p962_p13, %p961_p12 }
  0x3f   :  { %p964_p1 = pnand %p963_p0, %p957_p11 }
  0x41   :  { %967 = shalt.err (!%p964_p1)
}
  0x42   :  { %96 = dma.hbm_to_vmem [thread:$0]  %s1169_s8, 1024, %s91_s23, [#allocation12], %s1026_s4, %s1026_s4, %s1027_s17  }
  0x43   :  { %1008 = dma.done.wait [#allocation3], 64  }
  0x44   :  { %1009 = vsyncadd [#allocation3], 4294967232 }
  0x45   :  { %1010 = dma.done.wait [#allocation6], 1152  }
  0x46   :  { %1011 = vsyncadd [#allocation6], 4294966144 }
  0x47   :  { %1012 = dma.done.wait [#allocation9], 3072  }
  0x48   :  { %1013 = vsyncadd [#allocation9], 4294964224 }
  0x49   :  { %1014 = dma.done.wait [#allocation12], 1024  }
  0x4a   :  { %1015 = vsyncadd [#allocation12], 4294966272  ;;  %v1030_v0 = vmov 0.0   ;;  %vm1031_vm0 = vmmov 0   ;;  %v796_v1 = vld [vmem:[#allocation7 + $0x38] sm:$0xff]   ;;  %v797_v2 = vld [vmem:[#allocation7 + $0x30] sm:$0xff]   ;;  %v250_v49 = vlaneseq }
  0x4b   :  { %721 = vmatprep.subr.bf16.mxu0 %v1030_v0  ;;  %737 = vmatprep.mubr.msk.bf16.mxu0 %vm1031_vm0, %v1030_v0  ;;  %v798_v3 = vld [vmem:[#allocation7 + $0x28] sm:$0xff]   ;;  %v804_v4 = vld [vmem:[#allocation8 + $0x74] ss:$8 sps:$4 sm:$0xff]   ;;  %v806_v5 = vld [vmem:[#allocation8 + $0x70] ss:$8 sps:$4 sm:$0xff]   ;;  %v1032_v26 = vmov 0  }
  0x4c   :  { %722 = vmatpush3.bf16.msra.mxu0 %v796_v1  ;;  %v799_v6 = vld [vmem:[#allocation7 + $0x20] sm:$0xff]   ;;  %340 = vmatprep.subr.bf16.mxu1 %v804_v4  ;;  %v810_v9 = vld [vmem:[#allocation8 + $0x54] ss:$8 sps:$4 sm:$0xff]   ;;  %v812_v11 = vld [vmem:[#allocation8 + $0x50] ss:$8 sps:$4 sm:$0xff]   ;;  %v251_v50 = vshrl.u32 %v250_v49, 7 }
  0x4d   :  { %723 = vmatprep.subr.bf16.mxu0 %v1030_v0  ;;  %v807_v7 = vld [vmem:[#allocation8 + $0x64] ss:$8 sps:$4 sm:$0xff]   ;;  %341 = vmatpush1.bf16.msra.mxu1 %v806_v5  ;;  %v809_v8 = vld [vmem:[#allocation8 + $0x60] ss:$8 sps:$4 sm:$0xff]   ;;  %v800_v10 = vld [vmem:[#allocation7 + $0x18] sm:$0xff]   ;;  %s1033_s30 = smov [#allocation13]  }
  0x4e   :  { %342 = vmatprep.subr.bf16.mxu1 %v807_v7  ;;  %v801_v12 = vld [vmem:[#allocation7 + $0x10] sm:$0xff]   ;;  %v813_v13 = vld [vmem:[#allocation8 + $0x44] ss:$8 sps:$4 sm:$0xff]   ;;  %v815_v14 = vld [vmem:[#allocation8 + $0x40] ss:$8 sps:$4 sm:$0xff]   ;;  %372 = vmatprep.mubr.bf16.mxu1 %v1032_v26  ;;  %v252_v51 = vsub.s32 0, %v251_v50 }
  0x4f   :  { %v816_v15 = vld [vmem:[#allocation8 + $0x34] ss:$8 sps:$4 sm:$0xff]   ;;  %v802_v16 = vld [vmem:[#allocation7 + $0x8] sm:$0xff]   ;;  %v818_v17 = vld [vmem:[#allocation8 + $0x30] ss:$8 sps:$4 sm:$0xff]   ;;  %v256_v53 = vsub.s32 1, %v251_v50 }
  0x50   :  { %724 = vmatpush3.bf16.msra.mxu0 %v797_v2  ;;  %v819_v18 = vld [vmem:[#allocation8 + $0x24] ss:$8 sps:$4 sm:$0xff]   ;;  %v821_v20 = vld [vmem:[#allocation8 + $0x20] ss:$8 sps:$4 sm:$0xff]   ;;  %v822_v21 = vld [vmem:[#allocation8 + $0x14] ss:$8 sps:$4 sm:$0xff]  }
  0x51   :  { %725 = vmatprep.subr.bf16.mxu0 %v1030_v0  ;;  %343 = vmatpush1.bf16.msra.mxu1 %v809_v8  ;;  %v803_v19 = vld [vmem:[#allocation7] sm:$0xff]   ;;  %v118_v22 = vld [vmem:[#allocation2] sm:$0xf]  ;;  %v824_v23 = vld [vmem:[#allocation8 + $0x10] ss:$8 sps:$4 sm:$0xff]   ;;  %s624_s12 = sshll.u32 %s1033_s30, 4  ;;  %s625_s12 = int_to_ptr.vmem [resolvable:$true] %s624_s12 }
  0x52   :  { %344 = vmatprep.subr.bf16.mxu1 %v810_v9  ;;  %v825_v24 = vld [vmem:[#allocation8 + $0x4] ss:$8 sps:$4 sm:$0xff]   ;;  %v827_v25 = vld [vmem:[#allocation8] ss:$8 sps:$4 sm:$0xff]   ;;  %v828_v27 = vld [vmem:[#allocation10 + $0x38] sm:$0xff]   ;;  %s968_s13 = scalar_lea.vmem %s625_s12, 256  ;;  %p973_p3 = scmp.lt.s32.totalorder %s625_s12, %s625_s12 }
  0x53   :  { %v829_v28 = vld [vmem:[#allocation10 + $0x30] sm:$0xff]   ;;  %v830_v29 = vld [vmem:[#allocation10 + $0x28] sm:$0xff]   ;;  %v831_v30 = vld [vmem:[#allocation10 + $0x20] sm:$0xff]   ;;  %p969_p2 = scmp.ne.s32.totalorder %s625_s12, %s968_s13  ;;  %p974_p4 = scmp.lt.s32.totalorder %s968_s13, %s968_s13 }
  0x54   :  { %726 = vmatpush3.bf16.msra.mxu0 %v798_v3  ;;  %v832_v31 = vld [vmem:[#allocation10 + $0x18] sm:$0xff]   ;;  %v650_v32 = vld [vmem:[%s1164_s3] ss:$0 sm:$0xff]  ;;  %v834_v41 = vld [vmem:[#allocation10 + $0x8] sm:$0xff]  }
  0x55   :  { %727 = vmatprep.subr.bf16.mxu0 %v1030_v0  ;;  %345 = vmatpush1.bf16.msra.mxu1 %v812_v11  ;;  %v833_v40 = vld [vmem:[#allocation10 + $0x10] sm:$0xff]   ;;  %v835_v42 = vld [vmem:[#allocation10] sm:$0xff]   ;;  %v836_v43 = vld [vmem:[#allocation11 + $0x38] sm:$0xff]   ;;  %p975_p5 = por %p974_p4, %p973_p3 }
  0x56   :  { %346 = vmatprep.subr.bf16.mxu1 %v813_v13  ;;  %v837_v44 = vld [vmem:[#allocation11 + $0x30] sm:$0xff]   ;;  %v838_v45 = vld [vmem:[#allocation11 + $0x28] sm:$0xff]   ;;  %v839_v46 = vld [vmem:[#allocation11 + $0x20] sm:$0xff]  }
  0x57   :  { %v840_v47 = vld [vmem:[#allocation11 + $0x18] sm:$0xff]   ;;  %v841_v48 = vld [vmem:[#allocation11 + $0x10] sm:$0xff]   ;;  %v842_v3 = vld [vmem:[#allocation11 + $0x8] sm:$0xff]   ;;  %p976_p6 = pnand %p975_p5, %p969_p2 }
  0x58   :  { %728 = vmatpush3.bf16.msra.mxu0 %v799_v6  ;;  %v248_v52 = vld [vmem:[%s1166_s5] sm:$0x3]  ;;  %v381_v59 = vld [vmem:[#allocation5] sm:$0xff]  ;;  %v843_v4 = vld [vmem:[#allocation11] sm:$0xff]  }
  0x59   :  { %729 = vmatprep.subr.bf16.mxu0 %v1030_v0  ;;  %347 = vmatpush1.bf16.msra.mxu1 %v815_v14  ;;  %v253_v54 = vrot.slane %v248_v52, %v252_v51  ;;  %v257_v55 = vrot.slane %v248_v52, %v256_v53  ;;  %v675_v5 = vld [vmem:[%s1168_s7] ss:$0 sm:$0xff] }
  0x5a   :  { %348 = vmatprep.subr.bf16.mxu1 %v816_v15 }
  0x5c   :  { %730 = vmatpush3.bf16.msra.mxu0 %v800_v10 }
  0x5d   :  { %731 = vmatprep.subr.bf16.mxu0 %v1030_v0  ;;  %349 = vmatpush1.bf16.msra.mxu1 %v818_v17 }
  0x5e   :  { %350 = vmatprep.subr.bf16.mxu1 %v819_v18 }
  0x60   :  { %732 = vmatpush3.bf16.msra.mxu0 %v801_v12 }
  0x61   :  { %733 = vmatprep.subr.bf16.mxu0 %v1030_v0  ;;  %351 = vmatpush1.bf16.msra.mxu1 %v821_v20 }
  0x62   :  { %352 = vmatprep.subr.bf16.mxu1 %v822_v21 }
  0x64   :  { %734 = vmatpush3.bf16.msra.mxu0 %v802_v16 }
  0x65   :  { %735 = vmatprep.subr.bf16.mxu0 %v1030_v0  ;;  %353 = vmatpush1.bf16.msra.mxu1 %v824_v23 }
  0x66   :  { %354 = vmatprep.subr.bf16.mxu1 %v825_v24 }
  0x68   :  { %736 = vmatpush3.bf16.msra.mxu0 %v803_v19 }
  0x69   :  { %741 = vmatprep.subr.bf16.mxu0 %v1030_v0  ;;  %355 = vmatpush1.bf16.msra.mxu1 %v827_v25 }
  0x6a   :  { %761 = vmatprep.subr.bf16.mxu1 %v1030_v0 }
  0x6b   :  { %738 = vmatmul.mubr.bf16.vlgmr.msra.gmra.mxu0 %v118_v22 }
  0x6c   :  { %757 = vmatprep.mubr.msk.bf16.mxu0 %vm1031_vm0, %v1030_v0  ;;  %742 = vmatpush3.bf16.msra.mxu0 %v828_v27 }
  0x6d   :  { %743 = vmatprep.subr.bf16.mxu0 %v1030_v0 }
  0x70   :  { %744 = vmatpush3.bf16.msra.mxu0 %v829_v28 }
  0x71   :  { %745 = vmatprep.subr.bf16.mxu0 %v1030_v0 }
  0x74   :  { %746 = vmatpush3.bf16.msra.mxu0 %v830_v29 }
  0x75   :  { %747 = vmatprep.subr.bf16.mxu0 %v1030_v0 }
  0x78   :  { %748 = vmatpush3.bf16.msra.mxu0 %v831_v30 }
  0x79   :  { %749 = vmatprep.subr.bf16.mxu0 %v1030_v0 }
  0x7c   :  { %750 = vmatpush3.bf16.msra.mxu0 %v832_v31 }
  0x7d   :  { %751 = vmatprep.subr.bf16.mxu0 %v1030_v0 }
  0x80   :  { %752 = vmatpush3.bf16.msra.mxu0 %v833_v40 }
  0x81   :  { %753 = vmatprep.subr.bf16.mxu0 %v1030_v0 }
  0x84   :  { %754 = vmatpush3.bf16.msra.mxu0 %v834_v41 }
  0x85   :  { %755 = vmatprep.subr.bf16.mxu0 %v1030_v0 }
  0x88   :  { %756 = vmatpush3.bf16.msra.mxu0 %v835_v42 }
 0x12b   :  { %v224_v33 = vpop.f32.mrf.mxu0 }
 0x12c   :  { %v225_v34 = vadd.f32 %v650_v32, %v224_v33 }
 0x12d   :  { %v739_v35 = vpop.f32.mrf.mxu0 }
 0x12e   :  { %v230_v36 = vmax.f32 %v225_v34, 0.0 }
 0x12f   :  { %v227_v37 = vpop.f32.mrf.mxu0 }
 0x130   :  { %v231_v38 = vpack.c.bf16 %v230_v36, %v230_v36 }
 0x131   :  { %v740_v39 = vpop.f32.mrf.mxu0 }
 0x132   :  { %373 = vmatmul.mubr.bf16.vlgmr.msra.gmra.mxu1 %v231_v38 }
 0x133   :  { %777 = vmatprep.mubr.msk.bf16.mxu1 %vm1031_vm0, %v1030_v0  ;;  %762 = vmatpush3.bf16.msra.mxu1 %v836_v43 }
 0x134   :  { %763 = vmatprep.subr.bf16.mxu1 %v1030_v0 }
 0x137   :  { %764 = vmatpush3.bf16.msra.mxu1 %v837_v44 }
 0x138   :  { %765 = vmatprep.subr.bf16.mxu1 %v1030_v0 }
 0x13b   :  { %766 = vmatpush3.bf16.msra.mxu1 %v838_v45 }
 0x13c   :  { %767 = vmatprep.subr.bf16.mxu1 %v1030_v0 }
 0x13f   :  { %768 = vmatpush3.bf16.msra.mxu1 %v839_v46 }
 0x140   :  { %769 = vmatprep.subr.bf16.mxu1 %v1030_v0 }
 0x143   :  { %770 = vmatpush3.bf16.msra.mxu1 %v840_v47 }
 0x144   :  { %771 = vmatprep.subr.bf16.mxu1 %v1030_v0 }
 0x147   :  { %772 = vmatpush3.bf16.msra.mxu1 %v841_v48 }
 0x148   :  { %773 = vmatprep.subr.bf16.mxu1 %v1030_v0 }
 0x14b   :  { %774 = vmatpush3.bf16.msra.mxu1 %v842_v3 }
 0x14c   :  { %775 = vmatprep.subr.bf16.mxu1 %v1030_v0 }
 0x14f   :  { %776 = vmatpush3.bf16.msra.mxu1 %v843_v4 }
 0x1f2   :  { %v374_v56 = vpop.f32.mrf.mxu1 }
 0x1f3   :  { %v375_v57 = vadd.f32 %v374_v56, %v253_v54 }
 0x1f4   :  { %v376_v58 = vpop.f32.mrf.mxu1 }
 0x1f5   :  { %615 = vst [vmem:[#allocation13] sm:$0xff] %v375_v57  ;;  %v377_v60 = vadd.f32 %v376_v58, %v257_v55 }
 0x1f6   :  { %v378_v61 = vpop.f32.mrf.mxu1 }
 0x1f7   :  { %v382_v62 = vmul.f32 %v381_v59, %v377_v60  ;;  %616 = vst [vmem:[#allocation13 + $0x8] sm:$0xff] %v377_v60 }
 0x1f8   :  { %v379_v63 = vpop.f32.mrf.mxu1 }
 0x1f9   :  { %v383_v1 = vadd.f32 %v382_v62, %v375_v57 }
 0x1fb   :  { %v384_v2 = vpack.c.bf16 %v383_v1, %v383_v1 }
 0x1fd   :  { %758 = vmatmul.mubr.bf16.vlgmr.msra.gmra.mxu0 %v384_v2 }
 0x2bd   :  { %v490_v6 = vpop.f32.mrf.mxu0 }
 0x2be   :  { %v491_v7 = vadd.f32 %v675_v5, %v490_v6 }
 0x2bf   :  { %v759_v8 = vpop.f32.mrf.mxu0 }
 0x2c0   :  { %v496_v9 = vmax.f32 %v491_v7, 0.0 }
 0x2c1   :  { %v493_v10 = vpop.f32.mrf.mxu0 }
 0x2c2   :  { %v497_v11 = vpack.c.bf16 %v496_v9, %v496_v9 }
 0x2c3   :  { %v760_v12 = vpop.f32.mrf.mxu0 }
 0x2c4   :  { %778 = vmatmul.mubr.bf16.vlgmr.msra.gmra.mxu1 %v497_v11 }
 0x2c5   :  { %979 = shalt.err (!%p976_p6)
}
 0x2c6   :  { %627 = dma.vmem_to_hbm [thread:$0]  %s625_s12, 256, %s1171_s10, [#allocation4]   ;;  %v684_v0 = vld [vmem:[%s1170_s9] ss:$0 sm:$0xff] }
 0x2c7   :  { %s1034_s16 = smov [#allocation14]  }
 0x2c8   :  { %s634_s4 = sshll.u32 %s1034_s16, 4  ;;  %s635_s4 = int_to_ptr.vmem [resolvable:$true] %s634_s4 }
 0x2c9   :  { %s988_s10 = scalar_lea.vmem %s635_s4, 128  ;;  %p993_p8 = scmp.lt.s32.totalorder %s635_s4, %s635_s4 }
 0x2ca   :  { %p989_p7 = scmp.ne.s32.totalorder %s635_s4, %s988_s10  ;;  %p994_p9 = scmp.lt.s32.totalorder %s988_s10, %s988_s10 }
 0x2cc   :  { %p995_p10 = por %p994_p9, %p993_p8 }
 0x2ce   :  { %p996_p11 = pnand %p995_p10, %p989_p7 }
 0x384   :  { %v603_v13 = vpop.f32.mrf.mxu1 }
 0x385   :  { %v604_v14 = vadd.f32 %v684_v0, %v603_v13 }
 0x386   :  { %v779_v15 = vpop.f32.mrf.mxu1 }
 0x387   :  { %v693_v16 = vmul.f32 -1.442695, %v604_v14 }
 0x388   :  { %v606_v17 = vpop.f32.mrf.mxu1 }
 0x389   :  { %844 = vpow2.f32 %v693_v16 }
 0x38a   :  { %v780_v18 = vpop.f32.mrf.mxu1 }
 0x396   :  { %v845_v19 = vpop.eup %844 }
 0x397   :  { %v612_v20 = vadd.f32 1.0, %v845_v19 }
 0x399   :  { %846 = vrcp.f32 %v612_v20 }
 0x3a6   :  { %v847_v21 = vpop.eup %846 }
 0x3a7   :  { %617 = vst [vmem:[#allocation14] sm:$0xff] %v847_v21 }
 0x3a8   :  { %999 = shalt.err (!%p996_p11)
}
 0x3a9   :  { %637 = dma.vmem_to_hbm [thread:$0]  %s635_s4, 128, %s1172_s11, [#allocation15]  }
 0x3aa   :  { %1016 = dma.done.wait [#allocation4], 256  }
 0x3ab   :  { %1017 = vsyncadd [#allocation4], 4294967040 }
 0x3ac   :  { %1018 = dma.done.wait [#allocation15], 128  }
 0x3ad   :  { %1019 = vsyncadd [#allocation15], 4294967168 }
 0x3ae   :  { %644 = vsyncpa [#allocation3], 1 }
 0x3af   :  { %645 = vsyncpa [#allocation6], 1 }
 0x3b0   :  { %646 = vsyncpa [#allocation9], 1 }
 0x3b1   :  { %647 = vsyncpa [#allocation12], 1 }
 0x3b2   :  { %648 = vsyncpa [#allocation4], 1 }
 0x3b3   :  { %649 = vsyncpa [#allocation15], 1 }

</bundles_post_ra>
